<compile_context>
chip_gen: v7x
topology: tpu7x:2x2x1
jax: 0.10.0
libtpu: 0.0.40
codegen_flags: <defaults>
</compile_context>

<pallas_src>
import functools
import math

import jax
import jax.numpy as jnp
from jax.experimental import pallas as pl
from jax.experimental.pallas import tpu as pltpu

LANES = 128
MAX_TILE_ROWS = 2048   # 1 MiB (f32) per input block
NSPLIT = 2             # leading "parallel" grid axis -> both TCs on v7x


def _round_up(x, m):
    return ((x + m - 1) // m) * m


def _cdiv(a, b):
    return -(-a // b)


def _wbce_kernel(n_total, alpha, beta, has_weight, needs_mask,
                 tiles_per_split, tile_r, *refs):
    if has_weight:
        x_ref, t_ref, w_ref, o_ref, acc_ref = refs
    else:
        x_ref, t_ref, o_ref, acc_ref = refs

    c = pl.program_id(0)   # split index ("parallel": megacore on v7x)
    i = pl.program_id(1)   # row-tile within split ("arbitrary": reduction)

    # Per-core VMEM accumulator stays resident across the i axis.
    @pl.when(i == 0)
    def _():
        acc_ref[...] = jnp.zeros_like(acc_ref)

    x = x_ref[...].astype(jnp.float32)
    t = t_ref[...].astype(jnp.float32)

    # Numerically-stable BCE-with-logits; same values as the PyTorch algebra
    # (exp(-max_val) + exp(-input-max_val) == 1 + exp(-|x|)) but one exp + one log.
    loss = jnp.maximum(x, 0.0) - x * t + jnp.log(jnp.exp(-jnp.abs(x)) + 1.0)

    if has_weight:
        w = w_ref[...].astype(jnp.float32)
        loss = alpha * loss + beta * loss * w

    if needs_mask:
        # Only tiles whose flat element range extends past n_total contain padding
        # (the padded tail may span more than one tile for tiny inputs).
        tile_idx = c * tiles_per_split + i
        tile_end = (tile_idx + 1) * (tile_r * LANES)

        @pl.when(tile_end > n_total)
        def _():
            ridx = jax.lax.broadcasted_iota(jnp.int32, loss.shape, 0)
            lidx = jax.lax.broadcasted_iota(jnp.int32, loss.shape, 1)
            flat = (tile_idx * tile_r + ridx) * LANES + lidx
            acc_ref[...] += jnp.where(flat < n_total, loss, 0.0)

        @pl.when(tile_end <= n_total)
        def _():
            acc_ref[...] += loss
    else:
        acc_ref[...] += loss

    # Finalize: fold the (tile_r, 128) accumulator to one sublane-aligned (8, 128)
    # block per split. The reshape only splits the already 8-tiled leading dim
    # (no relayout); the sum is a short tree of full-vreg VPU adds, once per split.
    @pl.when(i == tiles_per_split - 1)
    def _():
        o_ref[...] = acc_ref[...].reshape(tile_r // 8, 8, LANES).sum(axis=0)


@functools.partial(jax.jit, static_argnames=("alpha", "beta", "size_average"))
def _wbce_impl(inp, target, weight, alpha, beta, size_average):
    n_total = math.prod(inp.shape)
    has_weight = weight is not None

    rows_needed = _cdiv(n_total, LANES)
    tile_r = min(MAX_TILE_ROWS, _round_up(_cdiv(rows_needed, NSPLIT), 8))
    tiles_per_split = _cdiv(rows_needed, NSPLIT * tile_r)
    n_rows = NSPLIT * tiles_per_split * tile_r
    needs_mask = (n_rows * LANES) != n_total

    def to_slab(a):
        # Keep native dtype (kernel casts per-tile in VMEM); pad only when needed.
        flat = jnp.ravel(a)
        pad = n_rows * LANES - n_total
        if pad:
            flat = jnp.pad(flat, (0, pad))
        return flat.reshape(n_rows, LANES)

    row_spec = pl.BlockSpec((tile_r, LANES),
                            lambda c, i: (c * tiles_per_split + i, 0))
    operands = [to_slab(inp), to_slab(target)]
    in_specs = [row_spec, row_spec]
    if has_weight:
        operands.append(to_slab(weight))
        in_specs.append(row_spec)

    kernel = functools.partial(
        _wbce_kernel, n_total, float(alpha), float(beta), has_weight,
        needs_mask, tiles_per_split, tile_r)

    partials = pl.pallas_call(
        kernel,
        out_shape=jax.ShapeDtypeStruct((NSPLIT, 8, LANES), jnp.float32),
        grid_spec=pltpu.PrefetchScalarGridSpec(
            num_scalar_prefetch=0,
            grid=(NSPLIT, tiles_per_split),
            in_specs=in_specs,
            out_specs=pl.BlockSpec((None, 8, LANES), lambda c, i: (c, 0, 0)),
            scratch_shapes=[pltpu.VMEM((tile_r, LANES), jnp.float32)],
        ),
        compiler_params=pltpu.CompilerParams(
            dimension_semantics=("parallel", "arbitrary")),
    )(*operands)

    # Tiny final reduction over the per-split (8, 128) partials (2048 f32).
    total = jnp.sum(partials)
    if size_average:
        return total / jnp.float32(n_total)
    return total


def weighted_bce_with_logits_loss(inp, target, weight=None, alpha=1.0, beta=1.0,
                                  size_average=True):
    if target.shape != inp.shape:
        raise ValueError(
            "Target size ({}) must be the same as input size ({})".format(
                target.shape, inp.shape))
    if weight is not None and weight.shape != inp.shape:
        raise ValueError("Weight size must match input size")
    return _wbce_impl(inp, target, weight, float(alpha), float(beta),
                      bool(size_average))


def _reference(inp, target, weight, alpha, beta, size_average=True):
    x = inp.astype(jnp.float32)
    t = target.astype(jnp.float32)
    max_val = jnp.maximum(-x, 0.0)
    loss = x - x * t + max_val + jnp.log(jnp.exp(-max_val) + jnp.exp(-x - max_val))
    if weight is not None:
        loss = alpha * loss + beta * loss * weight.astype(jnp.float32)
    return loss.mean() if size_average else loss.sum()


if __name__ == "__main__":
    key = jax.random.PRNGKey(0)
    alpha = 0.5   # Epsilon
    beta = 2.0    # Lambda_local

    cases = [
        # (shape, use_weight, size_average)
        ((2, 4, 16, 16), True, True),    # discriminator map; exact slab, no padding
        ((2, 3, 15, 17), False, False),  # ragged tail -> masked tile; no weight stream
        ((2, 4, 8, 8), True, True),      # tiny input -> padding spans multiple tiles
    ]

    for idx, (shape, use_weight, size_average) in enumerate(cases):
        k1, k2, k3, key = jax.random.split(key, 4)
        x = jax.random.normal(k1, shape, dtype=jnp.float32) * 3.0      # logits
        t = (jax.random.uniform(k2, shape) > 0.5).astype(jnp.float32)  # labels
        w = jax.random.uniform(k3, shape, dtype=jnp.float32) if use_weight else None

        out = weighted_bce_with_logits_loss(x, t, w, alpha, beta, size_average)
        out = jax.block_until_ready(out)
        ref = _reference(x, t, w, alpha, beta, size_average)
        assert jnp.allclose(out, ref, rtol=1e-5, atol=1e-5), (idx, out, ref)

    print("KERNEL_OK")
</pallas_src>

<mosaic_0001>
module attributes {stable_mosaic.version = 11 : i64} {
  func.func @_wbce_kernel(%arg0: i32, %arg1: i32, %arg2: memref<8x128xf32, #tpu.memory_space<vmem>>, %arg3: memref<8x128xf32, #tpu.memory_space<vmem>>, %arg4: memref<8x128xf32, #tpu.memory_space<vmem>>, %arg5: memref<1x8x128xf32, #tpu.memory_space<vmem>>, %arg6: memref<8x128xf32, #tpu.memory_space<vmem>>) attributes {dimension_semantics = [#tpu.dimension_semantics<parallel>, #tpu.dimension_semantics<arbitrary>], iteration_bounds = array<i64: 2, 1>, scalar_prefetch = 0 : i64, scratch_operands = 1 : i64, tpu.core_type = #tpu.core_type<tc>, window_params = [{transform_indices = @transform_0, window_bounds = array<i64: 8, 128>}, {transform_indices = @transform_1, window_bounds = array<i64: 8, 128>}, {transform_indices = @transform_2, window_bounds = array<i64: 8, 128>}, {transform_indices = @transform_3, window_bounds = array<i64: 1, 8, 128>}]} {
    %c0_i32 = arith.constant 0 : i32
    %0 = arith.cmpi eq, %arg1, %c0_i32 : i32
    %1 = arith.extui %0 : i1 to i32
    %c0_i32_0 = arith.constant 0 : i32
    %2 = arith.cmpi ne, %1, %c0_i32_0 : i32
    scf.if %2 {
      %cst_16 = arith.constant 0.000000e+00 : f32
      %30 = vector.broadcast %cst_16 : f32 to vector<8x128xf32>
      %c0_17 = arith.constant 0 : index
      %c0_18 = arith.constant 0 : index
      %31 = vector.load %arg6[%c0_17, %c0_18] : memref<8x128xf32, #tpu.memory_space<vmem>>, vector<8x128xf32>
      tpu.vector_store %arg6[%c0_17, %c0_18], %30 {strides = array<i32>} : memref<8x128xf32, #tpu.memory_space<vmem>>, vector<8x128xf32>,
    } else {
    }
    %c0 = arith.constant 0 : index
    %c0_1 = arith.constant 0 : index
    %3 = vector.load %arg2[%c0, %c0_1] : memref<8x128xf32, #tpu.memory_space<vmem>>, vector<8x128xf32>
    %c0_2 = arith.constant 0 : index
    %c0_3 = arith.constant 0 : index
    %4 = vector.load %arg3[%c0_2, %c0_3] : memref<8x128xf32, #tpu.memory_space<vmem>>, vector<8x128xf32>
    %cst = arith.constant 0.000000e+00 : f32
    %5 = vector.broadcast %cst : f32 to vector<8x128xf32>
    %6 = arith.maximumf %3, %5 : vector<8x128xf32>
    %7 = arith.mulf %3, %4 : vector<8x128xf32>
    %8 = arith.subf %6, %7 : vector<8x128xf32>
    %9 = math.absf %3 : vector<8x128xf32>
    %cst_4 = arith.constant 0.000000e+00 : f32
    %10 = vector.broadcast %cst_4 : f32 to vector<8x128xf32>
    %11 = arith.subf %10, %9 : vector<8x128xf32>
    %12 = math.exp %11 : vector<8x128xf32>
    %cst_5 = arith.constant 1.000000e+00 : f32
    %13 = vector.broadcast %cst_5 : f32 to vector<8x128xf32>
    %14 = arith.addf %12, %13 : vector<8x128xf32>
    %15 = math.log %14 : vector<8x128xf32>
    %16 = arith.addf %8, %15 : vector<8x128xf32>
    %c0_6 = arith.constant 0 : index
    %c0_7 = arith.constant 0 : index
    %17 = vector.load %arg4[%c0_6, %c0_7] : memref<8x128xf32, #tpu.memory_space<vmem>>, vector<8x128xf32>
    %cst_8 = arith.constant 5.000000e-01 : f32
    %18 = vector.broadcast %cst_8 : f32 to vector<8x128xf32>
    %19 = arith.mulf %18, %16 : vector<8x128xf32>
    %cst_9 = arith.constant 2.000000e+00 : f32
    %20 = vector.broadcast %cst_9 : f32 to vector<8x128xf32>
    %21 = arith.mulf %20, %16 : vector<8x128xf32>
    %22 = arith.mulf %21, %17 : vector<8x128xf32>
    %23 = arith.addf %19, %22 : vector<8x128xf32>
    %c0_10 = arith.constant 0 : index
    %c0_11 = arith.constant 0 : index
    %24 = vector.load %arg6[%c0_10, %c0_11] : memref<8x128xf32, #tpu.memory_space<vmem>>, vector<8x128xf32>
    %25 = arith.addf %24, %23 : vector<8x128xf32>
    %c0_12 = arith.constant 0 : index
    %c0_13 = arith.constant 0 : index
    %26 = vector.load %arg6[%c0_12, %c0_13] : memref<8x128xf32, #tpu.memory_space<vmem>>, vector<8x128xf32>
    tpu.vector_store %arg6[%c0_12, %c0_13], %25 {strides = array<i32>} : memref<8x128xf32, #tpu.memory_space<vmem>>, vector<8x128xf32>,
    %c0_i32_14 = arith.constant 0 : i32
    %27 = arith.cmpi eq, %arg1, %c0_i32_14 : i32
    %28 = arith.extui %27 : i1 to i32
    %c0_i32_15 = arith.constant 0 : i32
    %29 = arith.cmpi ne, %28, %c0_i32_15 : i32
    scf.if %29 {
      %c0_16 = arith.constant 0 : index
      %c0_17 = arith.constant 0 : index
      %30 = vector.load %arg6[%c0_16, %c0_17] : memref<8x128xf32, #tpu.memory_space<vmem>>, vector<8x128xf32>
      %31 = vector.shape_cast %30 : vector<8x128xf32> to vector<1x8x128xf32>
      %cst_18 = arith.constant dense<0.000000e+00> : vector<8x128xf32>
      %32 = vector.multi_reduction <add>, %31, %cst_18 [0] : vector<1x8x128xf32> to vector<8x128xf32>
      %c0_19 = arith.constant 0 : index
      %c0_20 = arith.constant 0 : index
      %c0_21 = arith.constant 0 : index
      %33 = vector.load %arg5[%c0_19, %c0_20, %c0_21] : memref<1x8x128xf32, #tpu.memory_space<vmem>>, vector<1x8x128xf32>
      %34 = vector.shape_cast %33 : vector<1x8x128xf32> to vector<8x128xf32>
      %35 = vector.shape_cast %32 : vector<8x128xf32> to vector<1x8x128xf32>
      tpu.vector_store %arg5[%c0_19, %c0_20, %c0_21], %35 {strides = array<i32>} : memref<1x8x128xf32, #tpu.memory_space<vmem>>, vector<1x8x128xf32>,
    } else {
    }
    return
  }
  func.func @transform_0(%arg0: i32, %arg1: i32) -> (i32, i32) {
    %c1_i32 = arith.constant 1 : i32
    %0 = arith.muli %arg0, %c1_i32 : i32
    %1 = arith.addi %0, %arg1 : i32
    %c0_i32 = arith.constant 0 : i32
    %c0_i32_0 = arith.constant 0 : i32
    return %1, %c0_i32 : i32, i32
  }
  func.func @transform_1(%arg0: i32, %arg1: i32) -> (i32, i32) {
    %c1_i32 = arith.constant 1 : i32
    %0 = arith.muli %arg0, %c1_i32 : i32
    %1 = arith.addi %0, %arg1 : i32
    %c0_i32 = arith.constant 0 : i32
    %c0_i32_0 = arith.constant 0 : i32
    return %1, %c0_i32 : i32, i32
  }
  func.func @transform_2(%arg0: i32, %arg1: i32) -> (i32, i32) {
    %c1_i32 = arith.constant 1 : i32
    %0 = arith.muli %arg0, %c1_i32 : i32
    %1 = arith.addi %0, %arg1 : i32
    %c0_i32 = arith.constant 0 : i32
    %c0_i32_0 = arith.constant 0 : i32
    return %1, %c0_i32 : i32, i32
  }
  func.func @transform_3(%arg0: i32, %arg1: i32) -> (i32, i32, i32) {
    %c0_i32 = arith.constant 0 : i32
    %c0_i32_0 = arith.constant 0 : i32
    %c0_i32_1 = arith.constant 0 : i32
    return %arg0, %c0_i32, %c0_i32_0 : i32, i32, i32
  }
}

</mosaic_0001>

<bundles_post_ra>
// kernel: _wbce_impl.1
= control target key start
LH: loop header
LB: loop body
LE: loop exit
PB: predicated region body
PF: predicated region fallthrough
CT: control target
= control target key end

     0   :  { %s433_s12 = smov 0   ;;  %s435_s13 = smov 0   ;;  %s472_s0 = inlined_call_operand.vmem [shape: f32[16,128], index: 0, kind: input, shape index: {}]   ;;  %s473_s1 = inlined_call_operand.vmem [shape: f32[16,128], index: 1, kind: input, shape index: {}]   ;;  %s474_s2 = inlined_call_operand.vmem [shape: f32[16,128], index: 2, kind: input, shape index: {}]   ;;  %s475_s3 = inlined_call_operand.vmem [shape: f32[2,8,128], index: 3, kind: output, shape index: {}]  }
   0x1   :  { %s437_s14 = smov 0  }
   0x2 LB: > { %s25_s15 = sadd.s32 1, %s407_s13  ;;  %p354_p0 = scmp.ge.s32.totalorder %s411_s14, 1  ;;  %s411_s14 = sphi %s437_s14, %s13_s14   ;;  %s407_s13 = sphi %s435_s13, %s477_s13   ;;  %s403_s12 = sphi %s433_s12, %s476_s12  }
   0x3   : > { %p27_p1 = scmp.ge.s32.totalorder %s25_s15, 2  ;;  %p178_p2 = scmp.lt.s32.totalorder %s411_s14, 3 }
   0x5   : > { %s479_s15 = smov (%p27_p1, %s25_s15), 0  ;;  %p179_p3 = pnand %p354_p0, %p178_p2 }
   0x6   : > { %p212_p4 = scmp.lt.s32.totalorder (!%p179_p3), %s403_s12, 1 }
   0x7   : > { %182 = sbr.rel (%p179_p3) target bundleno = 59 (0x3b), region = 32 }
   0xe   : > { %s481_s12 = smov (!%p212_p4, %s403_s12), 1 }
   0xf   : > { %s355_s16 = sshll.u32 %s481_s12, 3 }
  0x10   : > { %s215_s19 = scalar_lea.vmem %s472_s0, %s355_s16  ;;  %s221_s22 = scalar_lea.vmem %s473_s1, %s355_s16 }
  0x11   : > { %v238_v0 = vld [vmem:[%s215_s19] sm:$0xff]  ;;  %s227_s25 = scalar_lea.vmem %s474_s2, %s355_s16  ;;  %s232_s28 = scalar_lea.vmem %s475_s3, %s355_s16 }
  0x12   : > { %v243_v1 = vand.u32 2147483647, %v238_v0  ;;  %v239_v6 = vld [vmem:[%s221_s22] sm:$0xff]  ;;  %v240_v7 = vmax.f32 %v238_v0, 0.0 }
  0x13   : > { %v241_v8 = vmul.f32 %v239_v6, %v238_v0  ;;  %v251_v13 = vld [vmem:[%s227_s25] sm:$0xff] }
  0x14   : > { %v244_v2 = vsub.f32 0.0, %v243_v1 }
  0x15   : > { %v242_v9 = vsub.f32 %v240_v7, %v241_v8 }
  0x16   : > { %v245_v3 = vmul.f32 1.442695, %v244_v2 }
  0x18   : > { %385 = vpow2.f32 %v245_v3 }
  0x22   : > { %v386_v4 = vpop.eup %385 }
  0x23   : > { %v247_v5 = vadd.f32 1.0, %v386_v4 }
  0x25   : > { %387 = vlog2.f32 %v247_v5 }
  0x2f   : > { %v388_v10 = vpop.eup %387 }
  0x30   : > { %v249_v11 = vmul.f32 0.6931472, %v388_v10 }
  0x32   : > { %v250_v12 = vadd.f32 %v249_v11, %v242_v9 }
  0x34   : > { %v252_v14 = vmul.f32 0.5, %v250_v12  ;;  %v253_v15 = vmul.f32 2.0, %v250_v12 }
  0x36   : > { %v254_v16 = vmul.f32 %v253_v15, %v251_v13 }
  0x38   : > { %v255_v17 = vadd.f32 %v254_v16, %v252_v14 }
  0x3a   : > { %264 = vst [vmem:[%s232_s28] sm:$0xff] %v255_v17 }
  0x3b PF: > { %s13_s14 = sadd.s32 1, %s411_s14   ;;  %s476_s12 = smov %s407_s13 }
  0x3c   : > { %p10_p5 = scmp.ge.s32.totalorder %s13_s14, 4   ;;  %s477_s13 = smov %s479_s15 }
  0x3e   :  { %12 = sbr.rel (!%p10_p5) target bundleno = 2 (0x2), region = 76 }

</bundles_post_ra>
